<compile_context>
chip_gen: v7x
topology: tpu7x:2x2x1
jax: 0.10.0
libtpu: 0.0.40
codegen_flags: <defaults>
</compile_context>

<pallas_src>
import math
from functools import partial

import numpy as np
import jax
import jax.numpy as jnp
from jax.experimental import pallas as pl
from jax.experimental.pallas import tpu as pltpu


# -----------------------------------------------------------------------------
# Device-dependent knobs (scoped VMEM limit, v5e triple buffering)
# -----------------------------------------------------------------------------
def _device_kind():
    try:
        return jax.devices()[0].device_kind.lower()
    except Exception:
        return ""


_KIND = _device_kind()
_IS_V5 = "v5" in _KIND
if "v7" in _KIND:
    _VMEM_LIMIT = 32 * 1024 * 1024       # v7x: 64 MiB physical / TC -> conservative
elif any(v in _KIND for v in ("v4", "v5", "v6")):
    _VMEM_LIMIT = 64 * 1024 * 1024       # 128 MiB physical VMEM parts
else:
    _VMEM_LIMIT = 32 * 1024 * 1024
_TILE_BUDGET = int(_VMEM_LIMIT * 0.6)    # headroom for Mosaic-internal scratch


# -----------------------------------------------------------------------------
# 2D sin-cos positional embedding (deterministic, numpy — matches MAE reference)
# -----------------------------------------------------------------------------
def get_1d_sincos_pos_embed_from_grid(embed_dim, pos):
    omega = np.arange(embed_dim // 2, dtype=np.float64)
    omega /= embed_dim / 2.0
    omega = 1.0 / 10000 ** omega
    pos = pos.reshape(-1)
    out = np.einsum("m,d->md", pos, omega)
    return np.concatenate([np.sin(out), np.cos(out)], axis=1)


def get_2d_sincos_pos_embed(embed_dim, grid_size, cls_token=False):
    grid_h = np.arange(grid_size, dtype=np.float64)
    grid_w = np.arange(grid_size, dtype=np.float64)
    grid = np.meshgrid(grid_w, grid_h)            # w goes first
    grid = np.stack(grid, axis=0).reshape([2, 1, grid_size, grid_size])
    emb_h = get_1d_sincos_pos_embed_from_grid(embed_dim // 2, grid[0])
    emb_w = get_1d_sincos_pos_embed_from_grid(embed_dim // 2, grid[1])
    pos_embed = np.concatenate([emb_h, emb_w], axis=1)
    if cls_token:
        pos_embed = np.concatenate([np.zeros([1, embed_dim]), pos_embed], axis=0)
    return pos_embed.astype(np.float32)


# -----------------------------------------------------------------------------
# Tile planning helpers
# -----------------------------------------------------------------------------
def _round_up(x, m):
    return ((x + m - 1) // m) * m


def _pick_tile(dim, candidates):
    """(tile, padded_dim): prefer a candidate that divides `dim`; otherwise the
    largest candidate <= dim (caller zero-pads up to a multiple); for dims
    smaller than every candidate, a full-extent block (always layout-legal)."""
    for c in candidates:
        if dim % c == 0:
            return c, dim
    for c in candidates:
        if c <= dim:
            return c, _round_up(dim, c)
    return dim, dim


def _pick_k_tile(dim, candidates):
    """K is bounded by the model width, so a full-K fallback is VMEM-safe and
    avoids padding the contraction axis."""
    for c in candidates:
        if dim % c == 0:
            return c
    return dim


def _plan_tiles(M, K, N, *, fuse_ln, x_bytes, out_bytes, res_bytes):
    """Pick (tm, tn, tk) under the per-generation VMEM budget.  Starts from the
    large tile set and shrinks until the double-buffered working set fits."""
    plan = None
    for cands in ((512, 256, 128), (256, 128), (128,)):
        tm, Mp = _pick_tile(M, cands)
        tn, Np = _pick_tile(N, cands)
        tk = K if fuse_ln else _pick_k_tile(K, cands)
        k_steps = 1 if fuse_ln else (K // tk)
        need = 2 * (tm * tk * x_bytes + tk * tn * 2)      # x + bf16 weight, 2-buffered
        need += 2 * tm * tn * out_bytes                   # output tile, 2-buffered
        need += 2 * tm * tn * res_bytes                   # residual tile
        need += tm * tn * 4 if k_steps > 1 else 0         # f32 accumulator scratch
        need += tm * K * 2 if fuse_ln else 0              # cached LayerNorm(x) bf16
        plan = (tm, tn, tk, Mp, Np, k_steps)
        if need <= _TILE_BUDGET:
            break
    return plan


# -----------------------------------------------------------------------------
# Fused tiled linear kernel: [LayerNorm] -> matmul(bf16 MXU) + bias
#                            -> [GELU] -> [residual add]
# -----------------------------------------------------------------------------
def _fused_linear_kernel(*refs, fuse_ln, eps, activation, has_residual, k_steps):
    it = iter(refs)
    x_ref = next(it)
    w_ref = next(it)
    b_ref = next(it)
    g_ref = beta_ref = res_ref = None
    if fuse_ln:
        g_ref = next(it)
        beta_ref = next(it)
    if has_residual:
        res_ref = next(it)
    o_ref = next(it)
    ln_ref = next(it) if fuse_ln else None
    acc_ref = next(it) if k_steps > 1 else None

    if fuse_ln:
        # LayerNorm computed ONCE per row-tile (at the first N tile), cached as
        # bf16 in VMEM scratch and reused for every other N tile.
        @pl.when(pl.program_id(1) == 0)
        def _():
            xf = x_ref[...].astype(jnp.float32)
            mu = jnp.mean(xf, axis=-1, keepdims=True)
            var = jnp.mean((xf - mu) ** 2, axis=-1, keepdims=True)
            xn = (xf - mu) * jax.lax.rsqrt(var + eps) * g_ref[...] + beta_ref[...]
            ln_ref[...] = xn.astype(jnp.bfloat16)

        xb = ln_ref[...]
    else:
        xb = x_ref[...].astype(jnp.bfloat16)

    part = jnp.dot(xb, w_ref[...], preferred_element_type=jnp.float32)

    def _epilogue(acc):
        y = acc + b_ref[...]
        if activation == "gelu_erf":        # exact erf GELU (PyTorch nn.GELU default)
            y = 0.5 * y * (1.0 + jax.lax.erf(y * (1.0 / math.sqrt(2.0))))
        elif activation == "gelu_tanh":     # tanh approx: transcendental on the EUP
            y = 0.5 * y * (1.0 + jnp.tanh(0.7978845608028654 * (y + 0.044715 * y * y * y)))
        if has_residual:
            y = y + res_ref[...].astype(jnp.float32)
        o_ref[...] = y.astype(o_ref.dtype)

    if k_steps == 1:
        # Single K step: bypass the accumulator scratch (saves a tm x tn f32
        # VMEM round trip per tile and the scratch allocation entirely).
        _epilogue(part)
    else:
        k = pl.program_id(2)

        @pl.when(k == 0)
        def _():
            acc_ref[...] = jnp.zeros_like(acc_ref)

        acc_ref[...] += part

        @pl.when(k == k_steps - 1)
        def _():
            _epilogue(acc_ref[...])


def fused_linear(x, w, b, *, ln=None, eps=1e-6, activation=None, residual=None,
                 out_dtype=jnp.float32):
    """y = [residual +] [act]( LayerNorm?(x) @ w + b )

    x: (M, K) f32/bf16,  w: (K, N) bf16,  b: (1, N) f32,
    ln: optional (gamma, beta), each (1, K) f32 (pre-LayerNorm, forces tk == K),
    residual: optional (M, N) f32,
    out_dtype: f32 for the residual stream, bf16 for MXU-bound intermediates.
    """
    M, K = x.shape
    Kw, N = w.shape
    assert K == Kw
    fuse_ln = ln is not None
    has_res = residual is not None

    tm, tn, tk, Mp, Np, k_steps = _plan_tiles(
        M, K, N, fuse_ln=fuse_ln,
        x_bytes=x.dtype.itemsize, out_bytes=jnp.dtype(out_dtype).itemsize,
        res_bytes=4 if has_res else 0)

    # Zero-pad non-dividing M / N up to tile multiples (padding contributes 0 and
    # is sliced off) instead of silently falling back to huge full-extent blocks.
    if Mp != M:
        x = jnp.pad(x, ((0, Mp - M), (0, 0)))
    if Np != N:
        w = jnp.pad(w, ((0, 0), (0, Np - N)))
        b = jnp.pad(b, ((0, 0), (0, Np - N)))
    if has_res and (Mp != M or Np != N):
        residual = jnp.pad(residual, ((0, Mp - M), (0, Np - N)))

    grid = (Mp // tm, Np // tn, k_steps)

    def _w_spec():
        if _IS_V5 and k_steps > 1:
            try:   # v5e: 3-deep weight buffering hides the exposed weight DMA
                return pl.BlockSpec((tk, tn), lambda i, j, k: (k, j),
                                    pipeline_mode=pl.Buffered(3))
            except Exception:
                pass
        return pl.BlockSpec((tk, tn), lambda i, j, k: (k, j))

    in_specs = [pl.BlockSpec((tm, tk), lambda i, j, k: (i, k)),
                _w_spec(),
                pl.BlockSpec((1, tn), lambda i, j, k: (0, j))]
    args = [x, w, b]
    if fuse_ln:
        in_specs += [pl.BlockSpec((1, tk), lambda i, j, k: (0, k)),
                     pl.BlockSpec((1, tk), lambda i, j, k: (0, k))]
        args += [ln[0], ln[1]]
    if has_res:
        in_specs.append(pl.BlockSpec((tm, tn), lambda i, j, k: (i, j)))
        args.append(residual)

    scratch_shapes = []
    if fuse_ln:
        scratch_shapes.append(pltpu.VMEM((tm, K), jnp.bfloat16))   # cached LN(x)
    if k_steps > 1:
        scratch_shapes.append(pltpu.VMEM((tm, tn), jnp.float32))   # f32 accumulator

    # The LN cache relies on the j (N) axis iterating in order on a single core,
    # so it must not be megacore-sharded; the i (M) axis stays "parallel".
    dims = (("parallel", "arbitrary", "arbitrary") if fuse_ln
            else ("parallel", "parallel", "arbitrary"))

    kernel = partial(_fused_linear_kernel, fuse_ln=fuse_ln, eps=eps,
                     activation=activation, has_residual=has_res, k_steps=k_steps)
    y = pl.pallas_call(
        kernel,
        out_shape=jax.ShapeDtypeStruct((Mp, Np), out_dtype),
        grid=grid,
        in_specs=in_specs,
        out_specs=pl.BlockSpec((tm, tn), lambda i, j, k: (i, j)),
        scratch_shapes=scratch_shapes,
        compiler_params=pltpu.CompilerParams(
            dimension_semantics=dims, vmem_limit_bytes=_VMEM_LIMIT),
    )(*args)
    if Mp != M or Np != N:
        y = y[:M, :N]
    return y


# -----------------------------------------------------------------------------
# Attention: one batch element (all heads) per grid step, bf16 in / bf16 out,
# heads processed in pairs with direct lane-dense stores (no big concatenate).
# -----------------------------------------------------------------------------
def _attn_kernel(qkv_ref, o_ref, *, num_heads, scale):
    E = qkv_ref.shape[2] // 3
    Dh = E // num_heads
    qkv = qkv_ref[0]                                    # (T, 3E) bf16 slab
    # TODO(synk): batch the per-head QK^T / P.V as a 3-D dot_general with a head
    # batch dim to fill the 256-wide MXU better on v6e/v7x.
    h = 0
    while h < num_heads:
        hp = min(2, num_heads - h)
        outs = []
        for hh in range(h, h + hp):
            q = qkv[:, hh * Dh:(hh + 1) * Dh] * scale   # 1/sqrt(Dh) folded into q
            k = qkv[:, E + hh * Dh:E + (hh + 1) * Dh]
            v = qkv[:, 2 * E + hh * Dh:2 * E + (hh + 1) * Dh]
            # contract last axes of q and k => no explicit K transpose materialized
            s = jax.lax.dot_general(q, k, (((1,), (1,)), ((), ())),
                                    preferred_element_type=jnp.float32)  # (T, T)
            s = s - jnp.max(s, axis=-1, keepdims=True)
            p = jnp.exp(s)
            p = p * pl.reciprocal(jnp.sum(p, axis=-1, keepdims=True), approx=True)
            outs.append(jnp.dot(p.astype(jnp.bfloat16), v,
                                preferred_element_type=jnp.float32))     # (T, Dh)
        blk = outs[0] if hp == 1 else jnp.concatenate(outs, axis=-1)
        o_ref[0, :, h * Dh:(h + hp) * Dh] = blk.astype(o_ref.dtype)
        h += hp


def attention(qkv, num_heads):
    """qkv: (B, T, 3E) bf16 (timm layout: [q|k|v] x heads x Dh) -> (B, T, E) bf16."""
    B, T, E3 = qkv.shape
    E = E3 // 3
    Dh = E // num_heads
    qkv = qkv.astype(jnp.bfloat16)
    return pl.pallas_call(
        partial(_attn_kernel, num_heads=num_heads, scale=Dh ** -0.5),
        out_shape=jax.ShapeDtypeStruct((B, T, E), jnp.bfloat16),
        grid=(B,),
        in_specs=[pl.BlockSpec((1, T, E3), lambda b: (b, 0, 0))],
        out_specs=pl.BlockSpec((1, T, E), lambda b: (b, 0, 0)),
        compiler_params=pltpu.CompilerParams(
            dimension_semantics=("parallel",),
            vmem_limit_bytes=_VMEM_LIMIT),
    )(qkv)


# -----------------------------------------------------------------------------
# Masked MSE loss: tiled over rows, scalar accumulators, pl.when finalize
# -----------------------------------------------------------------------------
def _masked_mse_kernel(pred_ref, tgt_ref, mask_ref, o_ref, num_ref, den_ref, *, norm_pix):
    i = pl.program_id(0)

    @pl.when(i == 0)
    def _():
        num_ref[...] = jnp.zeros_like(num_ref)
        den_ref[...] = jnp.zeros_like(den_ref)

    tgt = tgt_ref[...]
    if norm_pix:
        mu = jnp.mean(tgt, axis=-1, keepdims=True)
        var = jnp.sum((tgt - mu) ** 2, axis=-1, keepdims=True) / (tgt.shape[-1] - 1)
        tgt = (tgt - mu) / jnp.sqrt(var + 1e-6)
    d = pred_ref[...] - tgt
    per_patch = jnp.mean(d * d, axis=-1, keepdims=True)      # (tr, 1)
    m = mask_ref[...]                                         # (tr, 1) -- tiny strided DMA, negligible
    num_ref[...] = num_ref[...] + jnp.sum(per_patch * m)
    den_ref[...] = den_ref[...] + jnp.sum(m)

    @pl.when(i == pl.num_programs(0) - 1)
    def _():
        # Matches the reference: divides by sum(mask) (inf/nan if nothing masked).
        o_ref[...] = num_ref[...] / den_ref[...]


def masked_mse_loss(pred, target, mask, norm_pix=False):
    """pred/target: (N, L, P) f32, mask: (N, L) f32 -> (1, 1) f32."""
    N, L, P = pred.shape
    M = N * L
    pred2 = pred.reshape(M, P)
    tgt2 = target.reshape(M, P)
    m2 = mask.reshape(M, 1)
    tr, Mp = _pick_tile(M, (1024, 512, 256, 128))
    if Mp != M:                       # zero rows / zero mask contribute nothing
        pad = Mp - M
        pred2 = jnp.pad(pred2, ((0, pad), (0, 0)))
        tgt2 = jnp.pad(tgt2, ((0, pad), (0, 0)))
        m2 = jnp.pad(m2, ((0, pad), (0, 0)))
    return pl.pallas_call(
        partial(_masked_mse_kernel, norm_pix=norm_pix),
        out_shape=jax.ShapeDtypeStruct((1, 1), jnp.float32),
        grid=(Mp // tr,),
        in_specs=[pl.BlockSpec((tr, P), lambda i: (i, 0)),
                  pl.BlockSpec((tr, P), lambda i: (i, 0)),
                  pl.BlockSpec((tr, 1), lambda i: (i, 0))],
        out_specs=pl.BlockSpec((1, 1), lambda i: (0, 0)),
        scratch_shapes=[pltpu.VMEM((1, 1), jnp.float32),
                        pltpu.VMEM((1, 1), jnp.float32)],
        compiler_params=pltpu.CompilerParams(
            dimension_semantics=("arbitrary",),
            vmem_limit_bytes=_VMEM_LIMIT),
    )(pred2, tgt2, m2)


# -----------------------------------------------------------------------------
# Model glue (plain JAX: reshapes, gathers, parameter plumbing)
# -----------------------------------------------------------------------------
def patchify(imgs, p):
    """imgs: (N, C, H, W) -> (N, L, p*p*C), matching MaskedAutoencoderViT.patchify."""
    N, C, H, W = imgs.shape
    h = w = H // p
    x = imgs.reshape(N, C, h, p, w, p)
    x = jnp.einsum("nchpwq->nhwpqc", x)
    return x.reshape(N, h * w, p * p * C)


def patch_embed(imgs, w, b, p):
    """Conv2d(kernel=stride=p) lowered to patch extraction + tiled Pallas matmul."""
    N, C, H, W = imgs.shape
    h = wg = H // p
    x = imgs.reshape(N, C, h, p, wg, p)
    x = jnp.transpose(x, (0, 2, 4, 1, 3, 5))       # n h w c p q  (c,p,q fastest)
    x = x.reshape(N * h * wg, C * p * p)
    y = fused_linear(x, w, b)                      # f32: feeds the residual stream
    return y.reshape(N, h * wg, -1)


def block_apply(x, blk, num_heads, eps, act):
    """timm Block: x + Attn(LN(x)); x + MLP(LN(x)) — LN/residual/GELU fused into matmuls."""
    B, T, E = x.shape
    x2 = x.reshape(B * T, E)

    # LN1 fused into qkv matmul; qkv slab emitted bf16 (consumed by the MXU next)
    qkv = fused_linear(x2, blk["qkv_w"], blk["qkv_b"],
                       ln=(blk["ln1_g"], blk["ln1_b"]), eps=eps,
                       out_dtype=jnp.bfloat16)                        # (B*T, 3E)
    attn = attention(qkv.reshape(B, T, 3 * E), num_heads)             # bf16 (B, T, E)
    # proj matmul with fused residual add (f32 residual stream)
    x2 = fused_linear(attn.reshape(B * T, E), blk["proj_w"], blk["proj_b"],
                      residual=x2)

    # LN2 + fc1 + GELU fused; fc1 activations emitted bf16
    h = fused_linear(x2, blk["fc1_w"], blk["fc1_b"],
                     ln=(blk["ln2_g"], blk["ln2_b"]), eps=eps,
                     activation=act, out_dtype=jnp.bfloat16)
    # fc2 with fused residual add
    x2 = fused_linear(h, blk["fc2_w"], blk["fc2_b"], residual=x2)
    return x2.reshape(B, T, E)


def random_masking(x, mask_ratio, key, ids_shuffle=None, ids_restore=None):
    N, L, D = x.shape
    len_keep = int(L * (1 - mask_ratio))
    if ids_shuffle is None:
        noise = jax.random.uniform(key, (N, L))
        ids_shuffle = jnp.argsort(noise, axis=1)
        ids_restore = jnp.argsort(ids_shuffle, axis=1)
    ids_keep = ids_shuffle[:, :len_keep]
    x_masked = jnp.take_along_axis(
        x, jnp.broadcast_to(ids_keep[:, :, None], (N, len_keep, D)), axis=1)
    mask = jnp.ones((N, L), jnp.float32).at[:, :len_keep].set(0.0)
    mask = jnp.take_along_axis(mask, ids_restore, axis=1)
    return x_masked, mask, ids_shuffle, ids_restore


def _gelu_act(cfg):
    return "gelu_erf" if cfg.get("gelu", "erf") == "erf" else "gelu_tanh"


def forward_encoder(params, cfg, imgs, mask_ratio, mask_key, ids_shuffle, ids_restore):
    p = cfg["patch_size"]
    eps = cfg["ln_eps"]
    act = _gelu_act(cfg)
    x = patch_embed(imgs, params["patch_w"], params["patch_b"], p)
    x = x + params["pos_embed"][:, 1:, :]
    x, mask, ids_shuffle, ids_restore = random_masking(
        x, mask_ratio, mask_key, ids_shuffle, ids_restore)
    cls_token = params["cls_token"] + params["pos_embed"][:, :1, :]
    cls_tokens = jnp.broadcast_to(cls_token, (x.shape[0], 1, x.shape[2]))
    x = jnp.concatenate([cls_tokens, x], axis=1)
    for blk in params["blocks"]:
        x = block_apply(x, blk, cfg["num_heads"], eps, act)
    # NOTE: the final encoder LayerNorm is fused into the decoder_embed matmul
    # (its only consumer in this forward pass), saving one HBM round trip.
    return x, mask, ids_shuffle, ids_restore


def forward_decoder(params, cfg, x, ids_restore):
    eps = cfg["ln_eps"]
    act = _gelu_act(cfg)
    B, T, E = x.shape
    # fused: encoder final LN + decoder_embed (f32: feeds the decoder residual stream)
    x1 = fused_linear(x.reshape(B * T, E), params["dec_embed_w"], params["dec_embed_b"],
                      ln=(params["norm_g"], params["norm_b"]), eps=eps)
    D = x1.shape[-1]
    x1 = x1.reshape(B, T, D)
    latent1 = x1

    L = ids_restore.shape[1]
    mask_tokens = jnp.broadcast_to(params["mask_token"], (B, L + 1 - T, D))
    x_ = jnp.concatenate([x1[:, 1:, :], mask_tokens], axis=1)
    x_ = jnp.take_along_axis(
        x_, jnp.broadcast_to(ids_restore[:, :, None], (B, L, D)), axis=1)
    xd = jnp.concatenate([x1[:, :1, :], x_], axis=1)
    xd = xd + params["dec_pos_embed"]
    for blk in params["dec_blocks"]:
        xd = block_apply(xd, blk, cfg["decoder_num_heads"], eps, act)
    B2, T2, _ = xd.shape
    # fused: decoder final LN + decoder_pred
    pred = fused_linear(xd.reshape(B2 * T2, D), params["dec_pred_w"], params["dec_pred_b"],
                        ln=(params["dec_norm_g"], params["dec_norm_b"]), eps=eps)
    pred = pred.reshape(B2, T2, -1)[:, 1:, :]
    return (pred,), (latent1,)


def forward_loss(params, cfg, imgs, preds, mask, weak_idx, teach_latent, latents):
    p = cfg["patch_size"]
    if weak_idx == 0:
        target = patchify(imgs[1], p)
    elif weak_idx == 1:
        target = patchify(imgs[2], p)
    else:
        raise NotImplementedError
    loss = masked_mse_loss(preds[0], target, mask,
                           norm_pix=cfg.get("norm_pix_loss", False))[0, 0]
    if teach_latent is not None:
        # TODO(synk): teacher-latent MSE distillation stays in plain JAX (rare path).
        diff = latents[0] - teach_latent[weak_idx]
        loss = loss + jnp.mean(diff * diff)
    return loss


def mae_forward(params, cfg, imgs, weak_idx, mask_key, mask_ratio=0.75,
                ids_shuffle=None, ids_restore=None, teach_latent=None):
    mixed_img = imgs[0]
    latent, mask, ids_shuffle, ids_restore = forward_encoder(
        params, cfg, mixed_img, mask_ratio, mask_key, ids_shuffle, ids_restore)
    preds, latents = forward_decoder(params, cfg, latent, ids_restore)
    loss = forward_loss(params, cfg, imgs, preds, mask, weak_idx, teach_latent, latents)
    return loss, preds, mask


# -----------------------------------------------------------------------------
# Deterministic parameter initialization (shapes follow the PyTorch __init__)
#   * matmul weights stored bf16 (MXU-native, halves weight HBM traffic)
#   * biases / LN params stored pre-broadcast as (1, N) f32
# -----------------------------------------------------------------------------
def init_params(key, cfg):
    p, C, E = cfg["patch_size"], cfg["in_chans"], cfg["embed_dim"]
    D = cfg["decoder_embed_dim"]
    grid = cfg["img_size"] // p
    hidden = int(E * cfg["mlp_ratio"])
    dhidden = int(D * cfg["mlp_ratio"])
    keys = iter(jax.random.split(key, 256))

    def xav(kin, kout):
        bound = math.sqrt(6.0 / (kin + kout))
        w = jax.random.uniform(next(keys), (kin, kout), jnp.float32, -bound, bound)
        return w.astype(jnp.bfloat16)

    def vec(n):
        return jnp.zeros((1, n), jnp.float32)

    def ones(n):
        return jnp.ones((1, n), jnp.float32)

    def make_block(dim, hid):
        return dict(
            ln1_g=ones(dim), ln1_b=vec(dim),
            qkv_w=xav(dim, 3 * dim), qkv_b=vec(3 * dim),
            proj_w=xav(dim, dim), proj_b=vec(dim),
            ln2_g=ones(dim), ln2_b=vec(dim),
            fc1_w=xav(dim, hid), fc1_b=vec(hid),
            fc2_w=xav(hid, dim), fc2_b=vec(dim),
        )

    return dict(
        patch_w=xav(C * p * p, E), patch_b=vec(E),
        cls_token=0.02 * jax.random.normal(next(keys), (1, 1, E), jnp.float32),
        pos_embed=jnp.asarray(get_2d_sincos_pos_embed(E, grid, cls_token=True))[None],
        blocks=[make_block(E, hidden) for _ in range(cfg["depth"])],
        norm_g=ones(E), norm_b=vec(E),
        dec_embed_w=xav(E, D), dec_embed_b=vec(D),
        mask_token=0.02 * jax.random.normal(next(keys), (1, 1, D), jnp.float32),
        dec_pos_embed=jnp.asarray(get_2d_sincos_pos_embed(D, grid, cls_token=True))[None],
        dec_blocks=[make_block(D, dhidden) for _ in range(cfg["decoder_depth"])],
        dec_norm_g=ones(D), dec_norm_b=vec(D),
        dec_pred_w=xav(D, p * p * C), dec_pred_b=vec(p * p * C),
    )


# -----------------------------------------------------------------------------
if __name__ == "__main__":
    # Small config chosen to exercise the main kernel paths: multi-tile N with
    # the per-row-tile LN cache, multi-step K accumulation (encoder fc2),
    # single-K accumulator bypass, N padding (decoder_pred N = 192), bf16
    # intermediates and paired-head attention stores.
    cfg = dict(
        img_size=32, patch_size=8, in_chans=3,
        embed_dim=256, depth=2, num_heads=4,
        decoder_embed_dim=128, decoder_depth=1, decoder_num_heads=4,
        mlp_ratio=4.0,
        ln_eps=1e-6,            # MAE reference models use partial(nn.LayerNorm, eps=1e-6)
        norm_pix_loss=False,
        gelu="erf",             # exact erf GELU (PyTorch default); "tanh" for EUP approx
    )

    key = jax.random.PRNGKey(0)
    k_param, k_img, k_mask = jax.random.split(key, 3)

    params = init_params(k_param, cfg)

    # three images: imgs[0] = mixed input, imgs[1]/imgs[2] = reconstruction targets
    imgs_all = jax.random.normal(
        k_img, (3, 2, cfg["in_chans"], cfg["img_size"], cfg["img_size"]),
        dtype=jnp.float32)
    imgs = [imgs_all[0], imgs_all[1], imgs_all[2]]

    loss, preds, mask = mae_forward(params, cfg, imgs, weak_idx=0,
                                    mask_key=k_mask, mask_ratio=0.75)
    jax.block_until_ready((loss, preds, mask))

    L = (cfg["img_size"] // cfg["patch_size"]) ** 2
    assert preds[0].shape == (2, L, cfg["patch_size"] ** 2 * cfg["in_chans"])
    assert mask.shape == (2, L)
    assert bool(jnp.isfinite(loss))
    print("KERNEL_OK")
</pallas_src>

<mosaic_0001>
module attributes {stable_mosaic.version = 11 : i64} {
  func.func @_fused_linear_kernel(%arg0: i32, %arg1: i32, %arg2: i32, %arg3: memref<32x192xf32, #tpu.memory_space<vmem>>, %arg4: memref<192x256xbf16, #tpu.memory_space<vmem>>, %arg5: memref<1x256xf32, #tpu.memory_space<vmem>>, %arg6: memref<32x256xf32, #tpu.memory_space<vmem>>) attributes {dimension_semantics = [#tpu.dimension_semantics<parallel>, #tpu.dimension_semantics<parallel>, #tpu.dimension_semantics<arbitrary>], iteration_bounds = array<i64: 1, 1, 1>, scalar_prefetch = 0 : i64, scratch_operands = 0 : i64, tpu.core_type = #tpu.core_type<tc>, window_params = [{transform_indices = @transform_0, window_bounds = array<i64: 32, 192>}, {transform_indices = @transform_1, window_bounds = array<i64: 192, 256>}, {transform_indices = @transform_2, window_bounds = array<i64: 1, 256>}, {transform_indices = @transform_3, window_bounds = array<i64: 32, 256>}]} {
    %c0 = arith.constant 0 : index
    %c0_0 = arith.constant 0 : index
    %0 = vector.load %arg3[%c0, %c0_0] : memref<32x192xf32, #tpu.memory_space<vmem>>, vector<32x192xf32>
    %1 = arith.truncf %0 : vector<32x192xf32> to vector<32x192xbf16>
    %c0_1 = arith.constant 0 : index
    %c0_2 = arith.constant 0 : index
    %2 = vector.load %arg4[%c0_1, %c0_2] : memref<192x256xbf16, #tpu.memory_space<vmem>>, vector<192x256xbf16>
    %cst = arith.constant dense<0.000000e+00> : vector<32x256xf32>
    %3 = tpu.matmul %1, %2, %cst {dimension_numbers = #tpu.dot_dimension_numbers<[1], [0], [0], [1], [0, 0, 1, 1], [], []>} : vector<32x192xbf16>, vector<192x256xbf16>, vector<32x256xf32> -> vector<32x256xf32>
    %c0_3 = arith.constant 0 : index
    %c0_4 = arith.constant 0 : index
    %4 = vector.load %arg5[%c0_3, %c0_4] : memref<1x256xf32, #tpu.memory_space<vmem>>, vector<1x256xf32>
    %5 = vector.broadcast %4 : vector<1x256xf32> to vector<32x256xf32>
    %6 = arith.addf %3, %5 : vector<32x256xf32>
    %c0_5 = arith.constant 0 : index
    %c0_6 = arith.constant 0 : index
    %7 = vector.load %arg6[%c0_5, %c0_6] : memref<32x256xf32, #tpu.memory_space<vmem>>, vector<32x256xf32>
    tpu.vector_store %arg6[%c0_5, %c0_6], %6 {strides = array<i32>} : memref<32x256xf32, #tpu.memory_space<vmem>>, vector<32x256xf32>,
    return
  }
  func.func @transform_0(%arg0: i32, %arg1: i32, %arg2: i32) -> (i32, i32) {
    %c0_i32 = arith.constant 0 : i32
    return %arg0, %arg2 : i32, i32
  }
  func.func @transform_1(%arg0: i32, %arg1: i32, %arg2: i32) -> (i32, i32) {
    %c0_i32 = arith.constant 0 : i32
    return %arg2, %arg1 : i32, i32
  }
  func.func @transform_2(%arg0: i32, %arg1: i32, %arg2: i32) -> (i32, i32) {
    %c0_i32 = arith.constant 0 : i32
    %c0_i32_0 = arith.constant 0 : i32
    return %c0_i32, %arg1 : i32, i32
  }
  func.func @transform_3(%arg0: i32, %arg1: i32, %arg2: i32) -> (i32, i32) {
    %c0_i32 = arith.constant 0 : i32
    return %arg0, %arg1 : i32, i32
  }
}

</mosaic_0001>

<bundles_post_ra>
// kernel: tpu_custom_call.1
= control target key start
LH: loop header
LB: loop body
LE: loop exit
PB: predicated region body
PF: predicated region fallthrough
CT: control target
= control target key end

     0   :  { %8 = vsyncpa [#allocation3], 0  ;;  %s535_s0 = inlined_call_operand.hbm [shape: f32[32,192], index: 0, kind: input, shape index: {}]   ;;  %s536_s1 = inlined_call_operand.hbm [shape: bf16[192,256], index: 1, kind: input, shape index: {}]   ;;  %s537_s2 = inlined_call_operand.vmem [shape: f32[1,256], index: 2, kind: input, shape index: {}]   ;;  %s538_s3 = inlined_call_operand.hbm [shape: f32[32,256], index: 3, kind: output, shape index: {}]  }
   0x1   :  { %9 = vsyncpa [#allocation6], 0 }
   0x2   :  { %10 = vsyncpa [#allocation4], 0  ;;  %s463_s12 = smov [#allocation2]   ;;  %s391_s16 = scalar_lea.hbm %s535_s0, 1024 }
   0x3   :  { %s16_s13 = sshll.u32 %s463_s12, 4  ;;  %p392_p0 = scmp.ne.s32.totalorder %s535_s0, %s391_s16  ;;  %s17_s13 = int_to_ptr.vmem [resolvable:$true] %s16_s13 }
   0x4   :  { %p395_p1 = scmp.lt.u32.totalorder %s391_s16, %s535_s0 }
   0x6   :  { %p397_p2 = pnand %p395_p1, %p392_p0 }
   0x8   :  { %400 = shalt.err (!%p397_p2)
}
   0x9   :  { %s401_s21 = scalar_lea.vmem %s17_s13, 1024  ;;  %p406_p4 = scmp.lt.s32.totalorder %s17_s13, %s17_s13 }
   0xa   :  { %p402_p3 = scmp.ne.s32.totalorder %s17_s13, %s401_s21  ;;  %p407_p5 = scmp.lt.s32.totalorder %s401_s21, %s401_s21 }
   0xc   :  { %p408_p6 = por %p407_p5, %p406_p4 }
   0xe   :  { %p409_p7 = pnand %p408_p6, %p402_p3 }
  0x10   :  { %412 = shalt.err (!%p409_p7)
}
  0x11   :  { %s464_s22 = smov 256   ;;  %s465_s23 = smov 16  }
  0x12   :  { %22 = dma.hbm_to_vmem [thread:$0]  %s535_s0, 1024, %s17_s13, [#allocation3], %s464_s22, %s464_s22, %s465_s23  }
  0x13   :  { %s466_s26 = smov [#allocation5]   ;;  %s413_s30 = scalar_lea.hbm %s536_s1, 3072 }
  0x14   :  { %s28_s27 = sshll.u32 %s466_s26, 4  ;;  %p414_p8 = scmp.ne.s32.totalorder %s536_s1, %s413_s30  ;;  %s29_s27 = int_to_ptr.vmem [resolvable:$true] %s28_s27 }
  0x15   :  { %p417_p9 = scmp.lt.u32.totalorder %s413_s30, %s536_s1 }
  0x17   :  { %p419_p10 = pnand %p417_p9, %p414_p8 }
  0x19   :  { %422 = shalt.err (!%p419_p10)
}
  0x1a   :  { %s423_s8 = scalar_lea.vmem %s29_s27, 3072  ;;  %p428_p12 = scmp.lt.s32.totalorder %s29_s27, %s29_s27 }
  0x1b   :  { %p424_p11 = scmp.ne.s32.totalorder %s29_s27, %s423_s8  ;;  %p429_p13 = scmp.lt.s32.totalorder %s423_s8, %s423_s8 }
  0x1d   :  { %p430_p0 = por %p429_p13, %p428_p12 }
  0x1f   :  { %p431_p1 = pnand %p430_p0, %p424_p11 }
  0x21   :  { %434 = shalt.err (!%p431_p1)
}
  0x22   :  { %s467_s0 = smov 128   ;;  %s468_s9 = smov 8  }
  0x23   :  { %34 = dma.hbm_to_vmem [thread:$0]  %s536_s1, 3072, %s29_s27, [#allocation6], %s467_s0, %s467_s0, %s468_s9  }
  0x24   :  { %457 = dma.done.wait [#allocation3], 1024  }
  0x25   :  { %458 = vsyncadd [#allocation3], 4294966272 }
  0x26   :  { %459 = dma.done.wait [#allocation6], 3072  }
  0x27   :  { %460 = vsyncadd [#allocation6], 4294964224  ;;  %v355_v0 = vld [vmem:[#allocation5 + $0x4] ss:$8 sps:$4 sm:$0xff]   ;;  %v357_v1 = vld [vmem:[#allocation5] ss:$8 sps:$4 sm:$0xff]   ;;  %v82_v36 = vlaneseq }
  0x28   :  { %219 = vmatprep.subr.bf16.mxu0 %v355_v0  ;;  %324 = vmatprep.subr.bf16.mxu1 %v355_v0  ;;  %v358_v2 = vld [vmem:[#allocation5 + $0x14] ss:$8 sps:$4 sm:$0xff]   ;;  %v360_v3 = vld [vmem:[#allocation5 + $0x10] ss:$8 sps:$4 sm:$0xff]   ;;  %v361_v4 = vld [vmem:[#allocation5 + $0x24] ss:$8 sps:$4 sm:$0xff]  }
  0x29   :  { %220 = vmatpush1.bf16.msra.mxu0 %v357_v1  ;;  %336 = vmatpush1.bf16.msra.mxu1 %v357_v1  ;;  %v363_v5 = vld [vmem:[#allocation5 + $0x20] ss:$8 sps:$4 sm:$0xff]   ;;  %v364_v6 = vld [vmem:[#allocation5 + $0x34] ss:$8 sps:$4 sm:$0xff]   ;;  %v366_v7 = vld [vmem:[#allocation5 + $0x30] ss:$8 sps:$4 sm:$0xff]  }
  0x2a   :  { %221 = vmatprep.subr.bf16.mxu0 %v358_v2  ;;  %325 = vmatprep.subr.bf16.mxu1 %v358_v2  ;;  %v367_v8 = vld [vmem:[#allocation5 + $0x44] ss:$8 sps:$4 sm:$0xff]   ;;  %v369_v9 = vld [vmem:[#allocation5 + $0x40] ss:$8 sps:$4 sm:$0xff]   ;;  %v370_v10 = vld [vmem:[#allocation5 + $0x54] ss:$8 sps:$4 sm:$0xff]  }
  0x2b   :  { %v45_v11 = vld [vmem:[#allocation2 + $0x8] sm:$0xff]  ;;  %v47_v12 = vld [vmem:[#allocation2 + $0x18] sm:$0xff]  ;;  %vm212_vm0 = vcmask 523264   ;;  %v44_v30 = vld [vmem:[#allocation2] sm:$0xff]  ;;  %v83_v37 = vshrl.u32 %v82_v36, 7  ;;  %s469_s13 = smov [#allocation7]  }
  0x2c   :  { %v49_v13 = vld [vmem:[#allocation2 + $0x28] sm:$0xff]  ;;  %v53_v14 = vpack.c.bf16 %v47_v12, %v45_v11  ;;  %v51_v15 = vld [vmem:[#allocation2 + $0x38] sm:$0xff]  ;;  %v46_v31 = vld [vmem:[#allocation2 + $0x10] sm:$0xff]  ;;  %s285_s14 = sshll.u32 %s469_s13, 4  ;;  %s286_s14 = int_to_ptr.vmem [resolvable:$true] %s285_s14 }
  0x2d   :  { %222 = vmatpush1.bf16.msra.mxu0 %v360_v3  ;;  %337 = vmatpush1.bf16.msra.mxu1 %v360_v3  ;;  %v55_v16 = vpack.c.bf16 %v51_v15, %v49_v13  ;;  %v372_v17 = vld [vmem:[#allocation5 + $0x50] ss:$8 sps:$4 sm:$0xff]   ;;  %v373_v18 = vld [vmem:[#allocation5 + $0x64] ss:$8 sps:$4 sm:$0xff]   ;;  %v375_v19 = vld [vmem:[#allocation5 + $0x60] ss:$8 sps:$4 sm:$0xff]   ;;  %v52_v34 = vpack.c.bf16 %v46_v31, %v44_v30  ;;  %p440_p3 = scmp.lt.s32.totalorder %s286_s14, %s286_s14 }
  0x2e   :  { %223 = vmatprep.subr.bf16.mxu0 %v361_v4  ;;  %326 = vmatprep.subr.bf16.mxu1 %v361_v4  ;;  %v376_v20 = vld [vmem:[#allocation5 + $0x74] ss:$8 sps:$4 sm:$0xff]   ;;  %v378_v21 = vld [vmem:[#allocation5 + $0x70] ss:$8 sps:$4 sm:$0xff]   ;;  %v379_v22 = vld [vmem:[#allocation5 + $0x84] ss:$8 sps:$4 sm:$0xff]  }
  0x2f   :  { %322 = vmatprep.mubr.msk.bf16.mxu0 %vm212_vm0, %v53_v14  ;;  %323 = vmatprep.mubr.msk.bf16.mxu1 %vm212_vm0, %v55_v16  ;;  %v381_v23 = vld [vmem:[#allocation5 + $0x80] ss:$8 sps:$4 sm:$0xff]   ;;  %v382_v24 = vld [vmem:[#allocation5 + $0x94] ss:$8 sps:$4 sm:$0xff]   ;;  %v384_v25 = vld [vmem:[#allocation5 + $0x90] ss:$8 sps:$4 sm:$0xff]  }
  0x30   :  { %v385_v26 = vld [vmem:[#allocation5 + $0xa4] ss:$8 sps:$4 sm:$0xff]   ;;  %v387_v27 = vld [vmem:[#allocation5 + $0xa0] ss:$8 sps:$4 sm:$0xff]   ;;  %v388_v28 = vld [vmem:[#allocation5 + $0xb4] ss:$8 sps:$4 sm:$0xff]  }
  0x31   :  { %224 = vmatpush1.bf16.msra.mxu0 %v363_v5  ;;  %338 = vmatpush1.bf16.msra.mxu1 %v363_v5  ;;  %v390_v29 = vld [vmem:[#allocation5 + $0xb0] ss:$8 sps:$4 sm:$0xff]   ;;  %v48_v32 = vld [vmem:[#allocation2 + $0x20] sm:$0xff]  ;;  %v84_v38 = vsub.s32 0, %v83_v37  ;;  %v88_v40 = vsub.s32 1, %v83_v37 }
  0x32   :  { %225 = vmatprep.subr.bf16.mxu0 %v364_v6  ;;  %327 = vmatprep.subr.bf16.mxu1 %v364_v6  ;;  %v50_v33 = vld [vmem:[#allocation2 + $0x30] sm:$0xff]  ;;  %v80_v39 = vld [vmem:[%s537_s2] sm:$0x3]  ;;  %s435_s2 = scalar_lea.vmem %s286_s14, 1024 }
  0x33   :  { %v54_v35 = vpack.c.bf16 %v50_v33, %v48_v32  ;;  %v85_v41 = vrot.slane %v80_v39, %v84_v38  ;;  %v89_v42 = vrot.slane %v80_v39, %v88_v40  ;;  %p436_p2 = scmp.ne.s32.totalorder %s286_s14, %s435_s2  ;;  %p441_p4 = scmp.lt.s32.totalorder %s435_s2, %s435_s2 }
  0x35   :  { %226 = vmatpush1.bf16.msra.mxu0 %v366_v7  ;;  %339 = vmatpush1.bf16.msra.mxu1 %v366_v7  ;;  %p442_p5 = por %p441_p4, %p440_p3 }
  0x36   :  { %227 = vmatprep.subr.bf16.mxu0 %v367_v8  ;;  %328 = vmatprep.subr.bf16.mxu1 %v367_v8 }
  0x37   :  { %p443_p6 = pnand %p442_p5, %p436_p2 }
  0x39   :  { %228 = vmatpush1.bf16.msra.mxu0 %v369_v9  ;;  %340 = vmatpush1.bf16.msra.mxu1 %v369_v9 }
  0x3a   :  { %229 = vmatprep.subr.bf16.mxu0 %v370_v10  ;;  %329 = vmatprep.subr.bf16.mxu1 %v370_v10 }
  0x3d   :  { %230 = vmatpush1.bf16.msra.mxu0 %v372_v17  ;;  %341 = vmatpush1.bf16.msra.mxu1 %v372_v17 }
  0x3e   :  { %231 = vmatprep.subr.bf16.mxu0 %v373_v18  ;;  %330 = vmatprep.subr.bf16.mxu1 %v373_v18 }
  0x41   :  { %232 = vmatpush1.bf16.msra.mxu0 %v375_v19  ;;  %342 = vmatpush1.bf16.msra.mxu1 %v375_v19 }
  0x42   :  { %233 = vmatprep.subr.bf16.mxu0 %v376_v20  ;;  %331 = vmatprep.subr.bf16.mxu1 %v376_v20 }
  0x45   :  { %234 = vmatpush1.bf16.msra.mxu0 %v378_v21  ;;  %343 = vmatpush1.bf16.msra.mxu1 %v378_v21 }
  0x46   :  { %235 = vmatprep.subr.bf16.mxu0 %v379_v22  ;;  %332 = vmatprep.subr.bf16.mxu1 %v379_v22 }
  0x49   :  { %236 = vmatpush1.bf16.msra.mxu0 %v381_v23  ;;  %344 = vmatpush1.bf16.msra.mxu1 %v381_v23 }
  0x4a   :  { %237 = vmatprep.subr.bf16.mxu0 %v382_v24  ;;  %333 = vmatprep.subr.bf16.mxu1 %v382_v24 }
  0x4d   :  { %238 = vmatpush1.bf16.msra.mxu0 %v384_v25  ;;  %345 = vmatpush1.bf16.msra.mxu1 %v384_v25 }
  0x4e   :  { %239 = vmatprep.subr.bf16.mxu0 %v385_v26  ;;  %334 = vmatprep.subr.bf16.mxu1 %v385_v26 }
  0x51   :  { %240 = vmatpush1.bf16.msra.mxu0 %v387_v27  ;;  %346 = vmatpush1.bf16.msra.mxu1 %v387_v27 }
  0x52   :  { %241 = vmatprep.subr.bf16.mxu0 %v388_v28  ;;  %335 = vmatprep.subr.bf16.mxu1 %v388_v28 }
  0x55   :  { %242 = vmatpush1.bf16.msra.mxu0 %v390_v29  ;;  %347 = vmatpush1.bf16.msra.mxu1 %v390_v29 }
  0x58   :  { %252 = vmatmul.mubr.bf16.vlgmr.msra.gmra.mrb[0].mxu0 %v52_v34  ;;  %262 = vmatmul.mubr.bf16.vlgmr.msra.gmra.mrb[0].mxu1 %v54_v35 }
 0x12b   :  { %v253_v43 = vpop.f32.mrb[0].mxu0  ;;  %v263_v44 = vpop.f32.mrb[0].mxu1 }
 0x12c   :  { %v254_v45 = vadd.f32 %v253_v43, %v85_v41  ;;  %v264_v46 = vadd.f32 %v263_v44, %v85_v41  ;;  %v255_v47 = vpop.f32.mrb[1].mxu0  ;;  %v265_v48 = vpop.f32.mrb[1].mxu1 }
 0x12d   :  { %v256_v49 = vadd.f32 %v255_v47, %v89_v42  ;;  %v266_v50 = vadd.f32 %v265_v48, %v89_v42  ;;  %v257_v51 = vpop.f32.mrb[2].mxu0  ;;  %v267_v52 = vpop.f32.mrb[2].mxu1 }
 0x12e   :  { %272 = vst [vmem:[#allocation7] sm:$0xff] %v254_v45  ;;  %276 = vst [vmem:[#allocation7 + $0x20] sm:$0xff] %v264_v46  ;;  %v258_v53 = vadd.f32 %v257_v51, %v85_v41  ;;  %v268_v54 = vadd.f32 %v267_v52, %v85_v41  ;;  %v259_v55 = vpop.f32.mrb[3].mxu0  ;;  %v269_v56 = vpop.f32.mrb[3].mxu1 }
 0x12f   :  { %273 = vst [vmem:[#allocation7 + $0x8] sm:$0xff] %v256_v49  ;;  %277 = vst [vmem:[#allocation7 + $0x28] sm:$0xff] %v266_v50  ;;  %v260_v57 = vadd.f32 %v259_v55, %v89_v42  ;;  %v270_v58 = vadd.f32 %v269_v56, %v89_v42 }
 0x130   :  { %274 = vst [vmem:[#allocation7 + $0x10] sm:$0xff] %v258_v53  ;;  %278 = vst [vmem:[#allocation7 + $0x30] sm:$0xff] %v268_v54 }
 0x131   :  { %275 = vst [vmem:[#allocation7 + $0x18] sm:$0xff] %v260_v57  ;;  %279 = vst [vmem:[#allocation7 + $0x38] sm:$0xff] %v270_v58 }
 0x132   :  { %446 = shalt.err (!%p443_p6)
}
 0x133   :  { %s447_s17 = scalar_lea.hbm %s538_s3, 1024 }
 0x134   :  { %p448_p7 = scmp.ne.s32.totalorder %s538_s3, %s447_s17  ;;  %p451_p8 = scmp.lt.u32.totalorder %s447_s17, %s538_s3 }
 0x136   :  { %p453_p9 = pnand %p451_p8, %p448_p7 }
 0x138   :  { %456 = shalt.err (!%p453_p9)
}
 0x139   :  { %291 = dma.vmem_to_hbm [thread:$0]  %s286_s14, 1024, %s538_s3, [#allocation4], %s464_s22, %s464_s22, %s465_s23  }
 0x13a   :  { %461 = dma.done.wait [#allocation4], 1024  }
 0x13b   :  { %462 = vsyncadd [#allocation4], 4294966272 }
 0x13c   :  { %295 = vsyncpa [#allocation3], 1 }
 0x13d   :  { %296 = vsyncpa [#allocation6], 1 }
 0x13e   :  { %297 = vsyncpa [#allocation4], 1 }

</bundles_post_ra>
